<compile_context>
chip_gen: v5e
topology: v5e:2x2
jax: 0.10.0
libtpu: 0.0.40
codegen_flags: <defaults>
</compile_context>

<pallas_src>
import functools

import jax
import jax.numpy as jnp
from jax import lax
from jax.experimental import pallas as pl
from jax.experimental.pallas import tpu as pltpu

LANE = 128
NEG_INF = -1e30  # finite "-inf": avoids inf-inf NaN corners in fully-masked tiles


def _round_up(x, m):
    return ((x + m - 1) // m) * m


# ---------------------------------------------------------------------------
# Kernel 1: diffusivity MLP   T = ReLU(Z @ W1 + b1) @ W2 + b2   (row-tiled)
# ---------------------------------------------------------------------------
def mlp_kernel(z_ref, w1_ref, b1_ref, w2_ref, b2_ref, t_ref):
    z = z_ref[...]                                                    # [tm, Dp]
    h = jnp.maximum(
        jnp.dot(z, w1_ref[...], preferred_element_type=jnp.float32) + b1_ref[...],
        0.0)
    t = jnp.dot(h, w2_ref[...], preferred_element_type=jnp.float32) + b2_ref[...]
    t_ref[...] = t.astype(t_ref.dtype)


# ---------------------------------------------------------------------------
# Kernel 2: flash-style diffusion propagation with online softmax
#   out = Z + tau * (softmax(T @ T^T, dim=1) @ Z - Z)
# ---------------------------------------------------------------------------
def flash_kernel(tq_ref, tk_ref, zv_ref, zq_ref, o_ref, m_sc, acc_sc,
                 *, tau, n_valid, n_pad, tile_k, ones_col):
    ki = pl.program_id(1)

    @pl.when(ki == 0)
    def _init():
        m_sc[...] = jnp.full_like(m_sc, NEG_INF)
        acc_sc[...] = jnp.zeros_like(acc_sc)

    # sim tile = Tq @ Tk^T, contracting the feature axis (no explicit transpose).
    sim = lax.dot_general(
        tq_ref[...], tk_ref[...],
        dimension_numbers=(((1,), (1,)), ((), ())),
        preferred_element_type=jnp.float32)                           # [tm, tk]

    if n_valid != n_pad:  # static: only emit the mask when node padding exists
        k_idx = ki * tile_k + lax.broadcasted_iota(jnp.int32, sim.shape, 1)
        sim = jnp.where(k_idx < n_valid, sim, NEG_INF)

    m_prev = m_sc[...]
    m_new = jnp.maximum(m_prev, jnp.max(sim, axis=1, keepdims=True))  # [tm, 1]
    alpha = jnp.exp(m_prev - m_new)
    e = jnp.exp(sim - m_new)                                          # [tm, tk]

    # e @ Zv accumulates the propagated values AND (via the constant-1.0 pad
    # lane `ones_col` of Zv) the running softmax denominator on the MXU.
    acc_sc[...] = alpha * acc_sc[...] + jnp.dot(
        e, zv_ref[...], preferred_element_type=jnp.float32)
    m_sc[...] = m_new

    @pl.when(ki == pl.num_programs(1) - 1)
    def _finalize():
        acc = acc_sc[...]                                             # [tm, Dp]
        denom = acc[:, ones_col:ones_col + 1]                         # [tm, 1]
        z_prop = acc * pl.reciprocal(denom, approx=False)             # exact for 1e-5 tol
        zq = zq_ref[...]
        o_ref[...] = (zq + tau * (z_prop - zq)).astype(o_ref.dtype)


# ---------------------------------------------------------------------------
# Wrappers
# ---------------------------------------------------------------------------
def prepare_diffusion_params(W1, b1, W2, b2):
    """One-time parameter padding (hoisted out of the per-call path).

    Weights are stored pre-transposed ([in, out]) so the kernel computes x @ W + b.
    The feature axis is padded to a lane-dense width with at least one spare zero
    lane, which the kernel repurposes for the MXU softmax-denominator trick.
    """
    D = W1.shape[0]
    Dp = _round_up(D + 1, LANE)   # >= D + 1  ->  a spare zero lane always exists

    def pad2(x):
        return jnp.pad(x.astype(jnp.float32),
                       ((0, Dp - x.shape[0]), (0, Dp - x.shape[1])))

    W1p = pad2(W1)
    W2p = pad2(W2)
    b1p = jnp.pad(b1.astype(jnp.float32), (0, Dp - D)).reshape(1, Dp)
    b2p = jnp.pad(b2.astype(jnp.float32), (0, Dp - D)).reshape(1, Dp)
    return (W1p, b1p, W2p, b2p, D)


def diffusion_layer(Z, params, tau=0.1, tile_n=256):
    """One diffusion step. Z: [N, D]; params from prepare_diffusion_params."""
    W1p, b1p, W2p, b2p, D = params
    N = Z.shape[0]
    Dp = W1p.shape[0]

    # Node-axis tiling: MXU/lane-dense tiles (256 fills the v6e/v7x 256x256 MXU),
    # clamped for small graphs. Np is a multiple of the tile so the grid is exact.
    tile = min(int(tile_n), _round_up(N, LANE))
    Np = _round_up(N, tile)
    n_tiles = Np // tile

    # Padded Z: zeros outside [N, D]; spare lane `D` carries a constant 1.0 so the
    # softmax denominator rides along the e @ Z matmul for free.
    Zp = jnp.zeros((Np, Dp), jnp.float32)
    Zp = Zp.at[:N, :D].set(Z.astype(jnp.float32))
    Zp = Zp.at[:, D].set(1.0)

    # --- diffusivity MLP (row-tiled; weights resident via constant index maps) ---
    mlp_cost = pl.CostEstimate(
        flops=2 * 2 * Np * Dp * Dp,
        transcendentals=0,
        bytes_accessed=4 * (2 * Np * Dp + 2 * Dp * Dp + 2 * Dp))

    T = pl.pallas_call(
        mlp_kernel,
        out_shape=jax.ShapeDtypeStruct((Np, Dp), jnp.float32),
        grid=(n_tiles,),
        in_specs=[
            pl.BlockSpec((tile, Dp), lambda i: (i, 0)),   # Z rows
            pl.BlockSpec((Dp, Dp), lambda i: (0, 0)),     # W1 (resident)
            pl.BlockSpec((1, Dp), lambda i: (0, 0)),      # b1
            pl.BlockSpec((Dp, Dp), lambda i: (0, 0)),     # W2 (resident)
            pl.BlockSpec((1, Dp), lambda i: (0, 0)),      # b2
        ],
        out_specs=pl.BlockSpec((tile, Dp), lambda i: (i, 0)),
        compiler_params=pltpu.CompilerParams(
            dimension_semantics=("parallel",)),
        cost_estimate=mlp_cost,
    )(Zp, W1p, b1p, W2p, b2p)

    # --- flash-style propagation: softmax(T @ T^T) @ Z with online softmax ---
    kernel = functools.partial(
        flash_kernel, tau=float(tau), n_valid=N, n_pad=Np,
        tile_k=tile, ones_col=D)

    # VMEM budget from tile math (double-buffered tiles + scratch + temporaries),
    # floored at the universal 16 MiB default and capped well under v7x's 64 MiB.
    vmem_est = 4 * (4 * 2 * tile * Dp        # 4 input tiles, double-buffered
                    + 2 * tile * Dp          # output tile, double-buffered
                    + tile * Dp + 8 * tile   # acc + m scratch
                    + 8 * tile * tile)       # sim / e / mask temporaries
    vmem_limit = int(min(max(vmem_est + (8 << 20), 16 << 20), 48 << 20))

    flash_cost = pl.CostEstimate(
        flops=2 * 2 * Np * Np * Dp,
        transcendentals=Np * Np,
        bytes_accessed=4 * Np * Dp * (2 * n_tiles + 3))

    out_p = pl.pallas_call(
        kernel,
        out_shape=jax.ShapeDtypeStruct((Np, Dp), jnp.float32),
        grid=(n_tiles, n_tiles),
        in_specs=[
            pl.BlockSpec((tile, Dp), lambda qi, ki: (qi, 0)),   # T, query rows
            pl.BlockSpec((tile, Dp), lambda qi, ki: (ki, 0)),   # T, key rows
            pl.BlockSpec((tile, Dp), lambda qi, ki: (ki, 0)),   # Z, values (+1.0 lane)
            pl.BlockSpec((tile, Dp), lambda qi, ki: (qi, 0)),   # Z, residual rows
        ],
        out_specs=pl.BlockSpec((tile, Dp), lambda qi, ki: (qi, 0)),
        scratch_shapes=[
            pltpu.VMEM((tile, 1), jnp.float32),    # running row max
            pltpu.VMEM((tile, Dp), jnp.float32),   # running values-&-denominator acc
        ],
        compiler_params=pltpu.CompilerParams(
            dimension_semantics=("parallel", "arbitrary"),
            vmem_limit_bytes=vmem_limit),
        cost_estimate=flash_cost,
    )(T, T, Zp, Zp)

    return out_p[:N, :D].astype(Z.dtype)


def diffusion_layer_ref(Z, W1, b1, W2, b2, tau=0.1):
    """Pure-JAX reference mirroring the PyTorch forward (full-f32 matmuls)."""
    with jax.default_matmul_precision("highest"):
        h = jnp.maximum(Z @ W1 + b1, 0.0)
        t = h @ W2 + b2
        sim = t @ t.T
        s = jax.nn.softmax(sim, axis=1)
        z_prop = s @ Z
        return Z + tau * (z_prop - Z)


if __name__ == "__main__":
    N, D = 64, 32   # N graph nodes, hidden_dim = 32
    tau = 0.1

    key = jax.random.PRNGKey(0)
    kz, k1, kb1, k2, kb2 = jax.random.split(key, 5)

    Z = jax.random.normal(kz, (N, D), dtype=jnp.float32)

    # Deterministic PyTorch-Linear-style init; weights pre-transposed ([in, out]).
    bound = 1.0 / jnp.sqrt(jnp.float32(D))
    W1 = jax.random.uniform(k1, (D, D), jnp.float32, -bound, bound)
    b1 = jax.random.uniform(kb1, (D,), jnp.float32, -bound, bound)
    W2 = jax.random.uniform(k2, (D, D), jnp.float32, -bound, bound)
    b2 = jax.random.uniform(kb2, (D,), jnp.float32, -bound, bound)

    params = prepare_diffusion_params(W1, b1, W2, b2)   # one-time weight prep (hoisted)
    out = diffusion_layer(Z, params, tau=tau)
    out = jax.block_until_ready(out)

    ref = diffusion_layer_ref(Z, W1, b1, W2, b2, tau=tau)
    assert out.shape == (N, D)
    err = float(jnp.max(jnp.abs(out - ref)))
    assert jnp.allclose(out, ref, atol=1e-5, rtol=1e-5), f"mismatch vs reference (max abs err {err})"

    print("KERNEL_OK")
</pallas_src>

<mosaic_0001>
module attributes {stable_mosaic.version = 11 : i64} {
  func.func @mlp_kernel(%arg0: i32, %arg1: memref<128x128xf32, #tpu.memory_space<vmem>>, %arg2: memref<128x128xf32, #tpu.memory_space<vmem>>, %arg3: memref<1x128xf32, #tpu.memory_space<vmem>>, %arg4: memref<128x128xf32, #tpu.memory_space<vmem>>, %arg5: memref<1x128xf32, #tpu.memory_space<vmem>>, %arg6: memref<128x128xf32, #tpu.memory_space<vmem>>) attributes {dimension_semantics = [#tpu.dimension_semantics<parallel>], iteration_bounds = array<i64: 1>, scalar_prefetch = 0 : i64, scratch_operands = 0 : i64, tpu.core_type = #tpu.core_type<tc>, window_params = [{transform_indices = @transform_0, window_bounds = array<i64: 128, 128>}, {pipeline_mode = #tpu.pipeline_mode<synchronous>, transform_indices = @transform_1, window_bounds = array<i64: 128, 128>}, {pipeline_mode = #tpu.pipeline_mode<synchronous>, transform_indices = @transform_2, window_bounds = array<i64: 1, 128>}, {pipeline_mode = #tpu.pipeline_mode<synchronous>, transform_indices = @transform_3, window_bounds = array<i64: 128, 128>}, {pipeline_mode = #tpu.pipeline_mode<synchronous>, transform_indices = @transform_4, window_bounds = array<i64: 1, 128>}, {transform_indices = @transform_5, window_bounds = array<i64: 128, 128>}]} {
    %c0 = arith.constant 0 : index
    %c0_0 = arith.constant 0 : index
    %0 = vector.load %arg1[%c0, %c0_0] : memref<128x128xf32, #tpu.memory_space<vmem>>, vector<128x128xf32>
    %c0_1 = arith.constant 0 : index
    %c0_2 = arith.constant 0 : index
    %1 = vector.load %arg2[%c0_1, %c0_2] : memref<128x128xf32, #tpu.memory_space<vmem>>, vector<128x128xf32>
    %cst = arith.constant dense<0.000000e+00> : vector<128x128xf32>
    %2 = tpu.matmul %0, %1, %cst {dimension_numbers = #tpu.dot_dimension_numbers<[1], [0], [0], [1], [0, 0, 1, 1], [], []>} : vector<128x128xf32>, vector<128x128xf32>, vector<128x128xf32> -> vector<128x128xf32>
    %c0_3 = arith.constant 0 : index
    %c0_4 = arith.constant 0 : index
    %3 = vector.load %arg3[%c0_3, %c0_4] : memref<1x128xf32, #tpu.memory_space<vmem>>, vector<1x128xf32>
    %4 = vector.broadcast %3 : vector<1x128xf32> to vector<128x128xf32>
    %5 = arith.addf %2, %4 : vector<128x128xf32>
    %cst_5 = arith.constant 0.000000e+00 : f32
    %6 = vector.broadcast %cst_5 : f32 to vector<128x128xf32>
    %7 = arith.maximumf %5, %6 : vector<128x128xf32>
    %c0_6 = arith.constant 0 : index
    %c0_7 = arith.constant 0 : index
    %8 = vector.load %arg4[%c0_6, %c0_7] : memref<128x128xf32, #tpu.memory_space<vmem>>, vector<128x128xf32>
    %cst_8 = arith.constant dense<0.000000e+00> : vector<128x128xf32>
    %9 = tpu.matmul %7, %8, %cst_8 {dimension_numbers = #tpu.dot_dimension_numbers<[1], [0], [0], [1], [0, 0, 1, 1], [], []>} : vector<128x128xf32>, vector<128x128xf32>, vector<128x128xf32> -> vector<128x128xf32>
    %c0_9 = arith.constant 0 : index
    %c0_10 = arith.constant 0 : index
    %10 = vector.load %arg5[%c0_9, %c0_10] : memref<1x128xf32, #tpu.memory_space<vmem>>, vector<1x128xf32>
    %11 = vector.broadcast %10 : vector<1x128xf32> to vector<128x128xf32>
    %12 = arith.addf %9, %11 : vector<128x128xf32>
    %c0_11 = arith.constant 0 : index
    %c0_12 = arith.constant 0 : index
    %13 = vector.load %arg6[%c0_11, %c0_12] : memref<128x128xf32, #tpu.memory_space<vmem>>, vector<128x128xf32>
    tpu.vector_store %arg6[%c0_11, %c0_12], %12 {strides = array<i32>} : memref<128x128xf32, #tpu.memory_space<vmem>>, vector<128x128xf32>,
    return
  }
  func.func @transform_0(%arg0: i32) -> (i32, i32) {
    %c0_i32 = arith.constant 0 : i32
    %c0_i32_0 = arith.constant 0 : i32
    return %arg0, %c0_i32 : i32, i32
  }
  func.func @transform_1(%arg0: i32) -> (i32, i32) {
    %c0_i32 = arith.constant 0 : i32
    %c0_i32_0 = arith.constant 0 : i32
    %c0_i32_1 = arith.constant 0 : i32
    return %c0_i32, %c0_i32_0 : i32, i32
  }
  func.func @transform_2(%arg0: i32) -> (i32, i32) {
    %c0_i32 = arith.constant 0 : i32
    %c0_i32_0 = arith.constant 0 : i32
    %c0_i32_1 = arith.constant 0 : i32
    return %c0_i32, %c0_i32_0 : i32, i32
  }
  func.func @transform_3(%arg0: i32) -> (i32, i32) {
    %c0_i32 = arith.constant 0 : i32
    %c0_i32_0 = arith.constant 0 : i32
    %c0_i32_1 = arith.constant 0 : i32
    return %c0_i32, %c0_i32_0 : i32, i32
  }
  func.func @transform_4(%arg0: i32) -> (i32, i32) {
    %c0_i32 = arith.constant 0 : i32
    %c0_i32_0 = arith.constant 0 : i32
    %c0_i32_1 = arith.constant 0 : i32
    return %c0_i32, %c0_i32_0 : i32, i32
  }
  func.func @transform_5(%arg0: i32) -> (i32, i32) {
    %c0_i32 = arith.constant 0 : i32
    %c0_i32_0 = arith.constant 0 : i32
    return %arg0, %c0_i32 : i32, i32
  }
}

</mosaic_0001>

<bundles_post_ra>
// kernel: tpu_custom_call.1
= control target key start
LH: loop header
LB: loop body
LE: loop exit
PB: predicated region body
PF: predicated region fallthrough
CT: control target
= control target key end

     0   :  { %10 = vsyncpa [#allocation3], 0  ;;  %s514_s0 = inlined_call_operand.hbm [shape: f32[128,128], index: 0, kind: input, shape index: {}]   ;;  %s515_s1 = inlined_call_operand.hbm [shape: f32[128,128], index: 1, kind: input, shape index: {}]   ;;  %s516_s2 = inlined_call_operand.vmem [shape: f32[1,128], index: 2, kind: input, shape index: {}]   ;;  %s517_s3 = inlined_call_operand.hbm [shape: f32[128,128], index: 3, kind: input, shape index: {}]   ;;  %s518_s4 = inlined_call_operand.vmem [shape: f32[1,128], index: 4, kind: input, shape index: {}]   ;;  %s519_s5 = inlined_call_operand.hbm [shape: f32[128,128], index: 5, kind: output, shape index: {}]  }
   0x1   :  { %11 = vsyncpa [#allocation6], 0 }
   0x2   :  { %12 = vsyncpa [#allocation4], 0  ;;  %s30_s20 = sshll.u32 %s515_s1, 4  ;;  %s448_s21 = smov [#allocation5]   ;;  %s31_s20 = int_to_ptr.hbm [resolvable:$true] %s30_s20 }
   0x3   :  { %s32_s22 = sshll.u32 %s448_s21, 4  ;;  %s17_s25 = sshll.u32 %s514_s0, 4  ;;  %s33_s22 = int_to_ptr.vmem [resolvable:$true] %s32_s22  ;;  %s18_s25 = int_to_ptr.hbm [resolvable:$true] %s17_s25 }
   0x4   :  { %s449_s26 = smov 128   ;;  %s450_s27 = smov 8  }
   0x5   :  { %38 = dma.hbm_to_vmem [thread:$0]  %s31_s20, 2048, %s33_s22, [#allocation6], %s449_s26, %s449_s26, %s450_s27  }
   0x6   :  { %s451_s28 = smov [#allocation2]   ;;  %s45_s1 = sshll.u32 %s517_s3, 4  ;;  %s46_s1 = int_to_ptr.hbm [resolvable:$true] %s45_s1 }
   0x7   :  { %s19_s29 = sshll.u32 %s451_s28, 4  ;;  %s452_s0 = smov [#allocation7]   ;;  %s20_s29 = int_to_ptr.vmem [resolvable:$true] %s19_s29 }
   0x8   :  { %25 = dma.hbm_to_vmem [thread:$0]  %s18_s25, 2048, %s20_s29, [#allocation3], %s449_s26, %s449_s26, %s450_s27  }
   0x9   :  { %s47_s7 = sshll.u32 %s452_s0, 4  ;;  %s48_s7 = int_to_ptr.vmem [resolvable:$true] %s47_s7 }
   0xa   :  { %53 = dma.hbm_to_vmem [thread:$0]  %s46_s1, 2048, %s48_s7, [#allocation6], %s449_s26, %s449_s26, %s450_s27  }
   0xb   :  { %442 = dma.done.wait [#allocation3], 2048  }
   0xc   :  { %443 = vsyncadd [#allocation3], 4294965248 }
   0xd   :  { %444 = dma.done.wait [#allocation6], 4096  }
   0xe   :  { %445 = vsyncadd [#allocation6], 4294963200  ;;  %v99_v0 = vld [vmem:[#allocation5 + $0x78] sm:$0xff]  ;;  %v98_v1 = vld [vmem:[#allocation5 + $0x70] sm:$0xff]  ;;  %s292_s13 = sshll.u32 %s519_s5, 4  ;;  %s293_s13 = int_to_ptr.hbm [resolvable:$true] %s292_s13 }
   0xf   :  { %306 = vmatpush.msra.mxu2 %v99_v0  ;;  %104 = vmatpush.msra.mxu0 %v99_v0  ;;  %v97_v2 = vld [vmem:[#allocation5 + $0x68] sm:$0xff]  ;;  %v96_v3 = vld [vmem:[#allocation5 + $0x60] sm:$0xff]  ;;  %v95_v4 = vld [vmem:[#allocation5 + $0x58] sm:$0xff] }
  0x10   :  { %v94_v5 = vld [vmem:[#allocation5 + $0x50] sm:$0xff]  ;;  %v93_v6 = vld [vmem:[#allocation5 + $0x48] sm:$0xff]  ;;  %v92_v7 = vld [vmem:[#allocation5 + $0x40] sm:$0xff] }
  0x11   :  { %307 = vmatpush.msra.mxu2 %v98_v1  ;;  %105 = vmatpush.msra.mxu0 %v98_v1  ;;  %v91_v8 = vld [vmem:[#allocation5 + $0x38] sm:$0xff]  ;;  %v90_v9 = vld [vmem:[#allocation5 + $0x30] sm:$0xff]  ;;  %v89_v10 = vld [vmem:[#allocation5 + $0x28] sm:$0xff] }
  0x12   :  { %v88_v11 = vld [vmem:[#allocation5 + $0x20] sm:$0xff]  ;;  %v87_v12 = vld [vmem:[#allocation5 + $0x18] sm:$0xff]  ;;  %v86_v13 = vld [vmem:[#allocation5 + $0x10] sm:$0xff] }
  0x13   :  { %308 = vmatpush.msra.mxu2 %v97_v2  ;;  %106 = vmatpush.msra.mxu0 %v97_v2  ;;  %v85_v14 = vld [vmem:[#allocation5 + $0x8] sm:$0xff]  ;;  %v84_v15 = vld [vmem:[#allocation5] sm:$0xff]  ;;  %v78_v20 = vld [vmem:[#allocation2 + $0x50] sm:$0xff] }
  0x14   :  { %v76_v16 = vld [vmem:[#allocation2 + $0x40] sm:$0xff]  ;;  %v77_v18 = vld [vmem:[#allocation2 + $0x48] sm:$0xff]  ;;  %v70_v21 = vld [vmem:[#allocation2 + $0x10] sm:$0xff] }
  0x15   :  { %309 = vmatpush.msra.mxu2 %v96_v3  ;;  %107 = vmatpush.msra.mxu0 %v96_v3  ;;  %v68_v17 = vld [vmem:[#allocation2] sm:$0xff]  ;;  %v69_v19 = vld [vmem:[#allocation2 + $0x8] sm:$0xff]  ;;  %v79_v22 = vld [vmem:[#allocation2 + $0x58] sm:$0xff] }
  0x16   :  { %v71_v23 = vld [vmem:[#allocation2 + $0x18] sm:$0xff]  ;;  %v199_v25 = vld [vmem:[#allocation7 + $0x70] sm:$0xff]  ;;  %v198_v26 = vld [vmem:[#allocation7 + $0x68] sm:$0xff] }
  0x17   :  { %310 = vmatpush.msra.mxu2 %v95_v4  ;;  %108 = vmatpush.msra.mxu0 %v95_v4  ;;  %v200_v24 = vld [vmem:[#allocation7 + $0x78] sm:$0xff]  ;;  %v197_v27 = vld [vmem:[#allocation7 + $0x60] sm:$0xff]  ;;  %v195_v31 = vld [vmem:[#allocation7 + $0x50] sm:$0xff] }
  0x18   :  { %322 = vmatpush.msra.mxu3 %v200_v24  ;;  %205 = vmatpush.msra.mxu1 %v200_v24  ;;  %v80_v28 = vld [vmem:[#allocation2 + $0x60] sm:$0xff]  ;;  %v196_v30 = vld [vmem:[#allocation7 + $0x58] sm:$0xff]  ;;  %v194_v32 = vld [vmem:[#allocation7 + $0x48] sm:$0xff] }
  0x19   :  { %311 = vmatpush.msra.mxu2 %v94_v5  ;;  %109 = vmatpush.msra.mxu0 %v94_v5  ;;  %v72_v29 = vld [vmem:[#allocation2 + $0x20] sm:$0xff]  ;;  %v81_v34 = vld [vmem:[#allocation2 + $0x68] sm:$0xff]  ;;  %v192_v36 = vld [vmem:[#allocation7 + $0x38] sm:$0xff] }
  0x1a   :  { %323 = vmatpush.msra.mxu3 %v199_v25  ;;  %206 = vmatpush.msra.mxu1 %v199_v25  ;;  %v193_v33 = vld [vmem:[#allocation7 + $0x40] sm:$0xff]  ;;  %v73_v35 = vld [vmem:[#allocation2 + $0x28] sm:$0xff]  ;;  %v191_v37 = vld [vmem:[#allocation7 + $0x30] sm:$0xff] }
  0x1b   :  { %312 = vmatpush.msra.mxu2 %v93_v6  ;;  %110 = vmatpush.msra.mxu0 %v93_v6  ;;  %v190_v38 = vld [vmem:[#allocation7 + $0x28] sm:$0xff]  ;;  %v189_v39 = vld [vmem:[#allocation7 + $0x20] sm:$0xff]  ;;  %v82_v40 = vld [vmem:[#allocation2 + $0x70] sm:$0xff] }
  0x1c   :  { %324 = vmatpush.msra.mxu3 %v198_v26  ;;  %207 = vmatpush.msra.mxu1 %v198_v26  ;;  %v74_v41 = vld [vmem:[#allocation2 + $0x30] sm:$0xff]  ;;  %v188_v42 = vld [vmem:[#allocation7 + $0x18] sm:$0xff]  ;;  %v186_v46 = vld [vmem:[#allocation7 + $0x8] sm:$0xff] }
  0x1d   :  { %313 = vmatpush.msra.mxu2 %v92_v7  ;;  %111 = vmatpush.msra.mxu0 %v92_v7  ;;  %v83_v43 = vld [vmem:[#allocation2 + $0x78] sm:$0xff]  ;;  %v187_v45 = vld [vmem:[#allocation7 + $0x10] sm:$0xff]  ;;  %v185_v47 = vld [vmem:[#allocation7] sm:$0xff] }
  0x1e   :  { %325 = vmatpush.msra.mxu3 %v197_v27  ;;  %208 = vmatpush.msra.mxu1 %v197_v27  ;;  %v75_v44 = vld [vmem:[#allocation2 + $0x38] sm:$0xff]  ;;  %v344_v48 = vld [vmem:[%s516_s2] ss:$0 sm:$0xff] }
  0x1f   :  { %314 = vmatpush.msra.mxu2 %v91_v8  ;;  %112 = vmatpush.msra.mxu0 %v91_v8 }
  0x20   :  { %326 = vmatpush.msra.mxu3 %v196_v30  ;;  %209 = vmatpush.msra.mxu1 %v196_v30 }
  0x21   :  { %315 = vmatpush.msra.mxu2 %v90_v9  ;;  %113 = vmatpush.msra.mxu0 %v90_v9 }
  0x22   :  { %327 = vmatpush.msra.mxu3 %v195_v31  ;;  %210 = vmatpush.msra.mxu1 %v195_v31 }
  0x23   :  { %316 = vmatpush.msra.mxu2 %v89_v10  ;;  %114 = vmatpush.msra.mxu0 %v89_v10 }
  0x24   :  { %328 = vmatpush.msra.mxu3 %v194_v32  ;;  %211 = vmatpush.msra.mxu1 %v194_v32 }
  0x25   :  { %317 = vmatpush.msra.mxu2 %v88_v11  ;;  %115 = vmatpush.msra.mxu0 %v88_v11 }
  0x26   :  { %329 = vmatpush.msra.mxu3 %v193_v33  ;;  %212 = vmatpush.msra.mxu1 %v193_v33  ;;  %v345_v33 = vld [vmem:[%s518_s4] ss:$0 sm:$0xff]  ;;  %s453_s4 = smov [#allocation8]  }
  0x27   :  { %318 = vmatpush.msra.mxu2 %v87_v12  ;;  %116 = vmatpush.msra.mxu0 %v87_v12  ;;  %s290_s10 = sshll.u32 %s453_s4, 4  ;;  %s291_s10 = int_to_ptr.vmem [resolvable:$true] %s290_s10 }
  0x28   :  { %330 = vmatpush.msra.mxu3 %v192_v36  ;;  %213 = vmatpush.msra.mxu1 %v192_v36 }
  0x29   :  { %319 = vmatpush.msra.mxu2 %v86_v13  ;;  %117 = vmatpush.msra.mxu0 %v86_v13 }
  0x2a   :  { %331 = vmatpush.msra.mxu3 %v191_v37  ;;  %214 = vmatpush.msra.mxu1 %v191_v37 }
  0x2b   :  { %320 = vmatpush.msra.mxu2 %v85_v14  ;;  %118 = vmatpush.msra.mxu0 %v85_v14 }
  0x2c   :  { %332 = vmatpush.msra.mxu3 %v190_v38  ;;  %215 = vmatpush.msra.mxu1 %v190_v38 }
  0x2d   :  { %321 = vmatpush.msra.mxu2 %v84_v15  ;;  %119 = vmatpush.msra.mxu0 %v84_v15 }
  0x2e   :  { %144 = vmatmul.f32.vlgmr.msra.gmra.mxu2 %v76_v16  ;;  %120 = vmatmul.f32.vlgmr.msra.gmra.mxu0 %v68_v17 }
  0x2f   :  { %333 = vmatpush.msra.mxu3 %v189_v39  ;;  %216 = vmatpush.msra.mxu1 %v189_v39 }
  0x31   :  { %334 = vmatpush.msra.mxu3 %v188_v42  ;;  %217 = vmatpush.msra.mxu1 %v188_v42 }
  0x33   :  { %335 = vmatpush.msra.mxu3 %v187_v45  ;;  %218 = vmatpush.msra.mxu1 %v187_v45 }
  0x35   :  { %336 = vmatpush.msra.mxu3 %v186_v46  ;;  %219 = vmatpush.msra.mxu1 %v186_v46 }
  0x36   :  { %147 = vmatmul.f32.gmra.mxu2 %v77_v18  ;;  %123 = vmatmul.f32.gmra.mxu0 %v69_v19 }
  0x37   :  { %337 = vmatpush.msra.mxu3 %v185_v47  ;;  %220 = vmatpush.msra.mxu1 %v185_v47 }
  0x3e   :  { %150 = vmatmul.f32.gmra.mxu2 %v78_v20  ;;  %126 = vmatmul.f32.gmra.mxu0 %v70_v21 }
  0x46   :  { %153 = vmatmul.f32.gmra.mxu2 %v79_v22  ;;  %129 = vmatmul.f32.gmra.mxu0 %v71_v23 }
  0x4e   :  { %156 = vmatmul.f32.gmra.mxu2 %v80_v28  ;;  %132 = vmatmul.f32.gmra.mxu0 %v72_v29 }
  0x56   :  { %159 = vmatmul.f32.gmra.mxu2 %v81_v34  ;;  %135 = vmatmul.f32.gmra.mxu0 %v73_v35 }
  0x5e   :  { %162 = vmatmul.f32.gmra.mxu2 %v82_v40  ;;  %138 = vmatmul.f32.gmra.mxu0 %v74_v41 }
  0x66   :  { %165 = vmatmul.f32.gmra.mxu2 %v83_v43  ;;  %141 = vmatmul.f32.gmra.mxu0 %v75_v44 }
  0xab   :  { %v121_v49 = vpop.f32.mrf.mxu0 }
  0xac   :  { %v122_v50 = vadd.f32 %v344_v48, %v121_v49 }
  0xae   :  { %v169_v51 = vmax.f32 %v122_v50, 0.0 }
  0xb0   :  { %221 = vmatmul.f32.vlgmr.msra.gmra.mxu1 %v169_v51 }
  0xb1   :  { %v145_v52 = vpop.f32.mrf.mxu2 }
  0xb2   :  { %v146_v53 = vadd.f32 %v344_v48, %v145_v52 }
  0xb3   :  { %v124_v54 = vpop.f32.mrf.mxu0 }
  0xb4   :  { %v177_v55 = vmax.f32 %v146_v53, 0.0  ;;  %v125_v56 = vadd.f32 %v344_v48, %v124_v54 }
  0xb6   :  { %245 = vmatmul.f32.vlgmr.msra.gmra.mxu3 %v177_v55  ;;  %v170_v57 = vmax.f32 %v125_v56, 0.0 }
  0xb8   :  { %224 = vmatmul.f32.gmra.mxu1 %v170_v57 }
  0xb9   :  { %v148_v58 = vpop.f32.mrf.mxu2 }
  0xba   :  { %v149_v59 = vadd.f32 %v344_v48, %v148_v58 }
  0xbb   :  { %v127_v60 = vpop.f32.mrf.mxu0 }
  0xbc   :  { %v178_v61 = vmax.f32 %v149_v59, 0.0  ;;  %v128_v62 = vadd.f32 %v344_v48, %v127_v60 }
  0xbe   :  { %248 = vmatmul.f32.gmra.mxu3 %v178_v61  ;;  %v171_v63 = vmax.f32 %v128_v62, 0.0 }
  0xc0   :  { %227 = vmatmul.f32.gmra.mxu1 %v171_v63 }
  0xc1   :  { %v151_v0 = vpop.f32.mrf.mxu2 }
  0xc2   :  { %v152_v1 = vadd.f32 %v344_v48, %v151_v0 }
  0xc3   :  { %v130_v2 = vpop.f32.mrf.mxu0 }
  0xc4   :  { %v179_v3 = vmax.f32 %v152_v1, 0.0  ;;  %v131_v4 = vadd.f32 %v344_v48, %v130_v2 }
  0xc6   :  { %251 = vmatmul.f32.gmra.mxu3 %v179_v3  ;;  %v172_v5 = vmax.f32 %v131_v4, 0.0 }
  0xc8   :  { %230 = vmatmul.f32.gmra.mxu1 %v172_v5 }
  0xc9   :  { %v154_v6 = vpop.f32.mrf.mxu2 }
  0xca   :  { %v155_v7 = vadd.f32 %v344_v48, %v154_v6 }
  0xcb   :  { %v133_v8 = vpop.f32.mrf.mxu0 }
  0xcc   :  { %v180_v9 = vmax.f32 %v155_v7, 0.0  ;;  %v134_v10 = vadd.f32 %v344_v48, %v133_v8 }
  0xce   :  { %254 = vmatmul.f32.gmra.mxu3 %v180_v9  ;;  %v173_v11 = vmax.f32 %v134_v10, 0.0 }
  0xd0   :  { %233 = vmatmul.f32.gmra.mxu1 %v173_v11 }
  0xd1   :  { %v157_v12 = vpop.f32.mrf.mxu2 }
  0xd2   :  { %v158_v13 = vadd.f32 %v344_v48, %v157_v12 }
  0xd3   :  { %v136_v14 = vpop.f32.mrf.mxu0 }
  0xd4   :  { %v181_v15 = vmax.f32 %v158_v13, 0.0  ;;  %v137_v16 = vadd.f32 %v344_v48, %v136_v14 }
  0xd6   :  { %257 = vmatmul.f32.gmra.mxu3 %v181_v15  ;;  %v174_v17 = vmax.f32 %v137_v16, 0.0 }
  0xd8   :  { %236 = vmatmul.f32.gmra.mxu1 %v174_v17 }
  0xd9   :  { %v160_v18 = vpop.f32.mrf.mxu2 }
  0xda   :  { %v161_v19 = vadd.f32 %v344_v48, %v160_v18 }
  0xdb   :  { %v139_v20 = vpop.f32.mrf.mxu0 }
  0xdc   :  { %v182_v21 = vmax.f32 %v161_v19, 0.0  ;;  %v140_v22 = vadd.f32 %v344_v48, %v139_v20 }
  0xde   :  { %260 = vmatmul.f32.gmra.mxu3 %v182_v21  ;;  %v175_v23 = vmax.f32 %v140_v22, 0.0 }
  0xe0   :  { %239 = vmatmul.f32.gmra.mxu1 %v175_v23 }
  0xe1   :  { %v163_v24 = vpop.f32.mrf.mxu2 }
  0xe2   :  { %v164_v25 = vadd.f32 %v344_v48, %v163_v24 }
  0xe3   :  { %v142_v26 = vpop.f32.mrf.mxu0 }
  0xe4   :  { %v183_v27 = vmax.f32 %v164_v25, 0.0  ;;  %v143_v28 = vadd.f32 %v344_v48, %v142_v26 }
  0xe6   :  { %263 = vmatmul.f32.gmra.mxu3 %v183_v27  ;;  %v176_v29 = vmax.f32 %v143_v28, 0.0 }
  0xe8   :  { %242 = vmatmul.f32.gmra.mxu1 %v176_v29 }
  0xe9   :  { %v166_v30 = vpop.f32.mrf.mxu2 }
  0xea   :  { %v167_v31 = vadd.f32 %v344_v48, %v166_v30 }
  0xec   :  { %v184_v32 = vmax.f32 %v167_v31, 0.0 }
  0xee   :  { %266 = vmatmul.f32.gmra.mxu3 %v184_v32 }
 0x12d   :  { %v222_v34 = vpop.f32.mrf.mxu1 }
 0x12e   :  { %v223_v35 = vadd.f32 %v345_v33, %v222_v34 }
 0x130   :  { %270 = vst [vmem:[#allocation8] sm:$0xff] %v223_v35 }
 0x135   :  { %v225_v36 = vpop.f32.mrf.mxu1 }
 0x136   :  { %v226_v37 = vadd.f32 %v345_v33, %v225_v36 }
 0x138   :  { %271 = vst [vmem:[#allocation8 + $0x8] sm:$0xff] %v226_v37 }
 0x139   :  { %v246_v38 = vpop.f32.mrf.mxu3 }
 0x13a   :  { %v247_v39 = vadd.f32 %v345_v33, %v246_v38 }
 0x13c   :  { %278 = vst [vmem:[#allocation8 + $0x40] sm:$0xff] %v247_v39 }
 0x13d   :  { %v228_v40 = vpop.f32.mrf.mxu1 }
 0x13e   :  { %v229_v41 = vadd.f32 %v345_v33, %v228_v40 }
 0x140   :  { %272 = vst [vmem:[#allocation8 + $0x10] sm:$0xff] %v229_v41 }
 0x141   :  { %v249_v42 = vpop.f32.mrf.mxu3 }
 0x142   :  { %v250_v43 = vadd.f32 %v345_v33, %v249_v42 }
 0x144   :  { %279 = vst [vmem:[#allocation8 + $0x48] sm:$0xff] %v250_v43 }
 0x145   :  { %v231_v44 = vpop.f32.mrf.mxu1 }
 0x146   :  { %v232_v45 = vadd.f32 %v345_v33, %v231_v44 }
 0x148   :  { %273 = vst [vmem:[#allocation8 + $0x18] sm:$0xff] %v232_v45 }
 0x149   :  { %v252_v46 = vpop.f32.mrf.mxu3 }
 0x14a   :  { %v253_v47 = vadd.f32 %v345_v33, %v252_v46 }
 0x14c   :  { %280 = vst [vmem:[#allocation8 + $0x50] sm:$0xff] %v253_v47 }
 0x14d   :  { %v234_v48 = vpop.f32.mrf.mxu1 }
 0x14e   :  { %v235_v49 = vadd.f32 %v345_v33, %v234_v48 }
 0x150   :  { %274 = vst [vmem:[#allocation8 + $0x20] sm:$0xff] %v235_v49 }
 0x151   :  { %v255_v50 = vpop.f32.mrf.mxu3 }
 0x152   :  { %v256_v51 = vadd.f32 %v345_v33, %v255_v50 }
 0x154   :  { %281 = vst [vmem:[#allocation8 + $0x58] sm:$0xff] %v256_v51 }
 0x155   :  { %v237_v52 = vpop.f32.mrf.mxu1 }
 0x156   :  { %v238_v53 = vadd.f32 %v345_v33, %v237_v52 }
 0x158   :  { %275 = vst [vmem:[#allocation8 + $0x28] sm:$0xff] %v238_v53 }
 0x159   :  { %v258_v54 = vpop.f32.mrf.mxu3 }
 0x15a   :  { %v259_v55 = vadd.f32 %v345_v33, %v258_v54 }
 0x15c   :  { %282 = vst [vmem:[#allocation8 + $0x60] sm:$0xff] %v259_v55 }
 0x15d   :  { %v240_v56 = vpop.f32.mrf.mxu1 }
 0x15e   :  { %v241_v57 = vadd.f32 %v345_v33, %v240_v56 }
 0x160   :  { %276 = vst [vmem:[#allocation8 + $0x30] sm:$0xff] %v241_v57 }
 0x161   :  { %v261_v58 = vpop.f32.mrf.mxu3 }
 0x162   :  { %v262_v59 = vadd.f32 %v345_v33, %v261_v58 }
 0x164   :  { %283 = vst [vmem:[#allocation8 + $0x68] sm:$0xff] %v262_v59 }
 0x165   :  { %v243_v60 = vpop.f32.mrf.mxu1 }
 0x166   :  { %v244_v61 = vadd.f32 %v345_v33, %v243_v60 }
 0x168   :  { %277 = vst [vmem:[#allocation8 + $0x38] sm:$0xff] %v244_v61 }
 0x169   :  { %v264_v62 = vpop.f32.mrf.mxu3 }
 0x16a   :  { %v265_v63 = vadd.f32 %v345_v33, %v264_v62 }
 0x16c   :  { %284 = vst [vmem:[#allocation8 + $0x70] sm:$0xff] %v265_v63 }
 0x171   :  { %v267_v0 = vpop.f32.mrf.mxu3 }
 0x172   :  { %v268_v1 = vadd.f32 %v345_v33, %v267_v0 }
 0x174   :  { %285 = vst [vmem:[#allocation8 + $0x78] sm:$0xff] %v268_v1 }
 0x175   :  { %298 = dma.vmem_to_hbm [thread:$0]  %s291_s10, 2048, %s293_s13, [#allocation4], %s449_s26, %s449_s26, %s450_s27  }
 0x176   :  { %446 = dma.done.wait [#allocation4], 2048  }
 0x177   :  { %447 = vsyncadd [#allocation4], 4294965248 }
 0x178   :  { %303 = vsyncpa [#allocation3], 1 }
 0x179   :  { %304 = vsyncpa [#allocation6], 1 }
 0x17a   :  { %305 = vsyncpa [#allocation4], 1 }

</bundles_post_ra>
